<compile_context>
chip_gen: v7x
topology: tpu7x:2x2x1
jax: 0.10.0
libtpu: 0.0.40
codegen_flags: <defaults>
</compile_context>

<pallas_src>
import functools

import jax
import jax.numpy as jnp
from jax.experimental import pallas as pl
from jax.experimental.pallas import tpu as pltpu

BETA = 100.0  # cfg.NETWORK.BETA (deterministic synthetic value)

_LANE = 128
_SUBLANE = 8


def _round_up(a, b):
    return ((a + b - 1) // b) * b


def _soft_argmax_kernel(x_ref, g_ref, o_ref, *, beta):
    # x_ref: (TM, N) native-dtype heatmap rows
    # g_ref: (N, K_pad) f32 lane-padded coordinate grid
    # o_ref: (TM, K_pad) f32 output tile
    x = x_ref[...].astype(jnp.float32) * beta
    m = jnp.max(x, axis=-1, keepdims=True)        # stable softmax (matches F.softmax)
    e = jnp.exp(x - m)                            # unnormalized weights (TM, N)
    s = jnp.sum(e, axis=-1, keepdims=True)        # (TM, 1) normalizer
    # Weighted sum over N == matmul with the grid on the MXU; normalization is
    # folded in afterwards so the divide is K_pad-wide instead of N-wide.
    acc = jnp.dot(e, g_ref[...], preferred_element_type=jnp.float32)  # (TM, K_pad)
    o_ref[...] = (acc * (1.0 / s)).astype(o_ref.dtype)


def soft_argmax(x, grids, *, beta=BETA, block_rows=256):
    """x: (B, C, *spatial), grids: (N, K) with N = prod(spatial). Returns (B, C, K)."""
    B, C = x.shape[0], x.shape[1]
    N = 1
    for d in x.shape[2:]:
        N *= d
    K = grids.shape[-1]
    assert grids.shape == (N, K)

    rows = B * C
    # Keep x in its native dtype (kernel casts); no wrapper-side pad or copy of x.
    xf = x.reshape(rows, N)

    # Lane-pad the (small) coordinate grid to 128 lanes -> lane-dense MXU RHS and
    # lane-dense output stores. Sliced back to K after the pallas_call.
    K_pad = _round_up(K, _LANE)
    g = jnp.zeros((N, K_pad), jnp.float32).at[:, :K].set(grids.astype(jnp.float32))

    # ---- row-tile sizing ----------------------------------------------------
    x_itemsize = jnp.dtype(x.dtype).itemsize
    # Cap the double-buffered x tile at ~16 MiB (fits v7x 64 MiB VMEM with room
    # for the grid / output buffers; comfortably inside v5e/v6e 128 MiB).
    max_tile_bytes = 16 * 1024 * 1024
    rows_by_vmem = max(_SUBLANE, max_tile_bytes // (2 * N * x_itemsize))
    br = max(_SUBLANE, (min(block_rows, rows_by_vmem) // _SUBLANE) * _SUBLANE)
    rows_8 = _round_up(rows, _SUBLANE)
    br = min(br, rows_8)
    # Give the v7x megacore (2 TCs, "parallel" grid axis) at least 2 steps when
    # there is enough work to split without shrinking tiles too far.
    if rows_8 >= 2 * _LANE and pl.cdiv(rows_8, br) < 2:
        br = _round_up(pl.cdiv(rows_8, 2), _SUBLANE)

    grid = (pl.cdiv(rows, br),)  # partial last block handled by Pallas masking;
    # padded-row garbage stays within its own (discarded) output rows.

    # VMEM budget: double-buffered x tile + grid + output tile, plus slack.
    vmem_bytes = (2 * br * N * x_itemsize
                  + 2 * N * K_pad * 4
                  + 2 * br * K_pad * 4
                  + (4 << 20))
    vmem_limit = int(min(max(vmem_bytes, 32 << 20), 48 << 20))

    out = pl.pallas_call(
        functools.partial(_soft_argmax_kernel, beta=float(beta)),
        out_shape=jax.ShapeDtypeStruct((rows, K_pad), jnp.float32),
        grid_spec=pltpu.PrefetchScalarGridSpec(
            num_scalar_prefetch=0,
            grid=grid,
            in_specs=[
                pl.BlockSpec((br, N), lambda i: (i, 0)),
                pl.BlockSpec((N, K_pad), lambda i: (0, 0)),  # constant block: fetched once
            ],
            out_specs=pl.BlockSpec((br, K_pad), lambda i: (i, 0)),
        ),
        compiler_params=pltpu.CompilerParams(
            dimension_semantics=("parallel",),
            vmem_limit_bytes=vmem_limit,
        ),
    )(xf, g)

    return out[:, :K].reshape(B, C, K)


def _reference(x, grids, beta=BETA):
    B, C = x.shape[0], x.shape[1]
    xf = x.reshape(B, C, -1, 1).astype(jnp.float32)
    p = jax.nn.softmax(beta * xf, axis=2)              # (B, C, N, 1)
    gg = grids[None, ...]                              # (1, N, K)
    y = p * gg                                         # (B, C, N, K)
    return jnp.sum(y, axis=2)                          # (B, C, K)


if __name__ == "__main__":
    key = jax.random.PRNGKey(0)
    kx, kg = jax.random.split(key)

    B, C, H, W, K = 2, 4, 16, 16, 3
    N = H * W
    x = jax.random.normal(kx, (B, C, H, W), dtype=jnp.float32)
    # Deterministic coordinate-like grid in [0, 1).
    grids = jax.random.uniform(kg, (N, K), dtype=jnp.float32)

    out = soft_argmax(x, grids)
    out = jax.block_until_ready(out)

    ref = _reference(x, grids)
    assert out.shape == (B, C, K)
    assert jnp.allclose(out, ref, atol=1e-5, rtol=1e-5), (
        f"max abs err {jnp.max(jnp.abs(out - ref))}"
    )
    print("KERNEL_OK")
</pallas_src>

<mosaic_0001>
module attributes {stable_mosaic.version = 11 : i64} {
  func.func @_soft_argmax_kernel(%arg0: i32, %arg1: memref<8x256xf32, #tpu.memory_space<vmem>>, %arg2: memref<256x128xf32, #tpu.memory_space<vmem>>, %arg3: memref<8x128xf32, #tpu.memory_space<vmem>>) attributes {dimension_semantics = [#tpu.dimension_semantics<parallel>], iteration_bounds = array<i64: 1>, scalar_prefetch = 0 : i64, scratch_operands = 0 : i64, tpu.core_type = #tpu.core_type<tc>, window_params = [{transform_indices = @transform_0, window_bounds = array<i64: 8, 256>}, {pipeline_mode = #tpu.pipeline_mode<synchronous>, transform_indices = @transform_1, window_bounds = array<i64: 256, 128>}, {transform_indices = @transform_2, window_bounds = array<i64: 8, 128>}]} {
    %c0 = arith.constant 0 : index
    %c0_0 = arith.constant 0 : index
    %0 = vector.load %arg1[%c0, %c0_0] : memref<8x256xf32, #tpu.memory_space<vmem>>, vector<8x256xf32>
    %cst = arith.constant 1.000000e+02 : f32
    %1 = vector.broadcast %cst : f32 to vector<8x256xf32>
    %2 = arith.mulf %0, %1 : vector<8x256xf32>
    %cst_1 = arith.constant dense<0xFF800000> : vector<8xf32>
    %3 = vector.multi_reduction <maximumf>, %2, %cst_1 [1] : vector<8x256xf32> to vector<8xf32>
    %4 = vector.shape_cast %3 : vector<8xf32> to vector<8x1xf32>
    %5 = vector.broadcast %4 : vector<8x1xf32> to vector<8x256xf32>
    %6 = arith.subf %2, %5 : vector<8x256xf32>
    %7 = math.exp %6 : vector<8x256xf32>
    %cst_2 = arith.constant dense<0.000000e+00> : vector<8xf32>
    %8 = vector.multi_reduction <add>, %7, %cst_2 [1] : vector<8x256xf32> to vector<8xf32>
    %9 = vector.shape_cast %8 : vector<8xf32> to vector<8x1xf32>
    %c0_3 = arith.constant 0 : index
    %c0_4 = arith.constant 0 : index
    %10 = vector.load %arg2[%c0_3, %c0_4] : memref<256x128xf32, #tpu.memory_space<vmem>>, vector<256x128xf32>
    %cst_5 = arith.constant dense<0.000000e+00> : vector<8x128xf32>
    %11 = tpu.matmul %7, %10, %cst_5 {dimension_numbers = #tpu.dot_dimension_numbers<[1], [0], [0], [1], [0, 0, 1, 1], [], []>} : vector<8x256xf32>, vector<256x128xf32>, vector<8x128xf32> -> vector<8x128xf32>
    %cst_6 = arith.constant 1.000000e+00 : f32
    %12 = vector.broadcast %cst_6 : f32 to vector<8x1xf32>
    %13 = arith.divf %12, %9 : vector<8x1xf32>
    %14 = vector.broadcast %13 : vector<8x1xf32> to vector<8x128xf32>
    %15 = arith.mulf %11, %14 : vector<8x128xf32>
    %c0_7 = arith.constant 0 : index
    %c0_8 = arith.constant 0 : index
    %16 = vector.load %arg3[%c0_7, %c0_8] : memref<8x128xf32, #tpu.memory_space<vmem>>, vector<8x128xf32>
    tpu.vector_store %arg3[%c0_7, %c0_8], %15 {strides = array<i32>} : memref<8x128xf32, #tpu.memory_space<vmem>>, vector<8x128xf32>,
    return
  }
  func.func @transform_0(%arg0: i32) -> (i32, i32) {
    %c0_i32 = arith.constant 0 : i32
    %c0_i32_0 = arith.constant 0 : i32
    return %arg0, %c0_i32 : i32, i32
  }
  func.func @transform_1(%arg0: i32) -> (i32, i32) {
    %c0_i32 = arith.constant 0 : i32
    %c0_i32_0 = arith.constant 0 : i32
    %c0_i32_1 = arith.constant 0 : i32
    return %c0_i32, %c0_i32_0 : i32, i32
  }
  func.func @transform_2(%arg0: i32) -> (i32, i32) {
    %c0_i32 = arith.constant 0 : i32
    %c0_i32_0 = arith.constant 0 : i32
    return %arg0, %c0_i32 : i32, i32
  }
}

</mosaic_0001>

<bundles_post_ra>
// kernel: tpu_custom_call.1
= control target key start
LH: loop header
LB: loop body
LE: loop exit
PB: predicated region body
PF: predicated region fallthrough
CT: control target
= control target key end

     0   :  { %7 = vsyncpa [#allocation3], 0  ;;  %s397_s0 = inlined_call_operand.hbm [shape: f32[8,256], index: 0, kind: input, shape index: {}]   ;;  %s398_s1 = inlined_call_operand.hbm [shape: f32[256,128], index: 1, kind: input, shape index: {}]   ;;  %s399_s2 = inlined_call_operand.hbm [shape: f32[8,128], index: 2, kind: output, shape index: {}]  }
   0x1   :  { %8 = vsyncpa [#allocation6], 0 }
   0x2   :  { %9 = vsyncpa [#allocation4], 0  ;;  %s326_s9 = smov [#allocation2]   ;;  %s327_s11 = smov [#allocation5]  }
   0x3   :  { %s16_s10 = sshll.u32 %s326_s9, 4  ;;  %s25_s12 = sshll.u32 %s327_s11, 4  ;;  %s17_s10 = int_to_ptr.vmem [resolvable:$true] %s16_s10  ;;  %s346_s12 = int_to_ptr.vmem [resolvable:$true] %s25_s12 }
   0x4   :  { %s254_s15 = scalar_lea.hbm %s397_s0, 256 }
   0x5   :  { %p255_p0 = scmp.ne.s32.totalorder %s397_s0, %s254_s15  ;;  %p258_p1 = scmp.lt.u32.totalorder %s254_s15, %s397_s0 }
   0x7   :  { %p260_p2 = pnand %p258_p1, %p255_p0 }
   0x9   :  { %263 = shalt.err (!%p260_p2)
}
   0xa   :  { %s264_s20 = scalar_lea.vmem %s17_s10, 256  ;;  %p269_p4 = scmp.lt.s32.totalorder %s17_s10, %s17_s10 }
   0xb   :  { %p265_p3 = scmp.ne.s32.totalorder %s17_s10, %s264_s20  ;;  %p270_p5 = scmp.lt.s32.totalorder %s264_s20, %s264_s20 }
   0xd   :  { %p271_p6 = por %p270_p5, %p269_p4 }
   0xf   :  { %p272_p7 = pnand %p271_p6, %p265_p3 }
  0x11   :  { %275 = shalt.err (!%p272_p7)
}
  0x12   :  { %19 = dma.hbm_to_vmem [thread:$0]  %s397_s0, 256, %s17_s10, [#allocation3]  }
  0x13   :  { %s276_s25 = scalar_lea.hbm %s398_s1, 4096 }
  0x14   :  { %p277_p8 = scmp.ne.s32.totalorder %s398_s1, %s276_s25  ;;  %p280_p9 = scmp.lt.u32.totalorder %s276_s25, %s398_s1 }
  0x16   :  { %p282_p10 = pnand %p280_p9, %p277_p8 }
  0x18   :  { %285 = shalt.err (!%p282_p10)
}
  0x19   :  { %s286_s30 = scalar_lea.vmem %s346_s12, 4096  ;;  %p291_p12 = scmp.lt.s32.totalorder %s346_s12, %s346_s12 }
  0x1a   :  { %p287_p11 = scmp.ne.s32.totalorder %s346_s12, %s286_s30  ;;  %p292_p13 = scmp.lt.s32.totalorder %s286_s30, %s286_s30 }
  0x1c   :  { %p293_p0 = por %p292_p13, %p291_p12 }
  0x1e   :  { %p294_p1 = pnand %p293_p0, %p287_p11 }
  0x20   :  { %297 = shalt.err (!%p294_p1)
}
  0x21   :  { %s328_s0 = smov 128   ;;  %s329_s3 = smov 8  }
  0x22   :  { %31 = dma.hbm_to_vmem [thread:$0]  %s398_s1, 4096, %s346_s12, [#allocation6], %s328_s0, %s328_s0, %s329_s3  }
  0x23   :  { %320 = dma.done.wait [#allocation3], 256  }
  0x24   :  { %321 = vsyncadd [#allocation3], 4294967040 }
  0x25   :  { %322 = dma.done.wait [#allocation6], 4096  }
  0x26   :  { %323 = vsyncadd [#allocation6], 4294963200  ;;  %v38_v0 = vld [vmem:[#allocation2] sm:$0xff]  ;;  %v39_v1 = vld [vmem:[#allocation2 + $0x8] sm:$0xff]  ;;  %s330_s1 = smov [#allocation7]  }
  0x27   :  { %v70_v2 = vld [vmem:[#allocation5 + $0x80] sm:$0xff]  ;;  %v377_v3 = vmul.f32 100.0, %v38_v0  ;;  %v379_v4 = vmul.f32 100.0, %v39_v1  ;;  %v71_v5 = vld [vmem:[#allocation5 + $0x88] sm:$0xff]  ;;  %v72_v10 = vld [vmem:[#allocation5 + $0x90] sm:$0xff]  ;;  %s166_s6 = sshll.u32 %s330_s1, 4  ;;  %s167_s6 = int_to_ptr.vmem [resolvable:$true] %s166_s6 }
  0x28   :  { %v54_v6 = vld [vmem:[#allocation5] sm:$0xff]  ;;  %v55_v7 = vld [vmem:[#allocation5 + $0x8] sm:$0xff]  ;;  %v211_v8 = vpack.c.bf16 %v71_v5, %v70_v2  ;;  %v73_v11 = vld [vmem:[#allocation5 + $0x98] sm:$0xff]  ;;  %s298_s7 = scalar_lea.vmem %s167_s6, 128  ;;  %p303_p3 = scmp.lt.s32.totalorder %s167_s6, %s167_s6 }
  0x29   :  { %v213_v9 = vpack.c.bf16 %v55_v7, %v54_v6  ;;  %v56_v12 = vld [vmem:[#allocation5 + $0x10] sm:$0xff]  ;;  %v42_v13 = vmax.f32 %v377_v3, %v379_v4  ;;  %v215_v14 = vpack.c.bf16 %v73_v11, %v72_v10  ;;  %v57_v15 = vld [vmem:[#allocation5 + $0x18] sm:$0xff]  ;;  %v74_v16 = vld [vmem:[#allocation5 + $0xa0] sm:$0xff]  ;;  %p299_p2 = scmp.ne.s32.totalorder %s167_s6, %s298_s7  ;;  %p304_p4 = scmp.lt.s32.totalorder %s298_s7, %s298_s7 }
  0x2a   :  { %v75_v17 = vld [vmem:[#allocation5 + $0xa8] sm:$0xff]  ;;  %212 = vmatprep.subr.bf16.mxu0 %v211_v8  ;;  %v217_v18 = vpack.c.bf16 %v57_v15, %v56_v12  ;;  %v58_v20 = vld [vmem:[#allocation5 + $0x20] sm:$0xff]  ;;  %v76_v22 = vld [vmem:[#allocation5 + $0xb0] sm:$0xff] }
  0x2b   :  { %43 = vmax.xlane.f32.xlu0 %v42_v13  ;;  %214 = vmatpush3.bf16.msra.mxu0 %v213_v9  ;;  %v219_v19 = vpack.c.bf16 %v75_v17, %v74_v16  ;;  %v59_v21 = vld [vmem:[#allocation5 + $0x28] sm:$0xff]  ;;  %v77_v23 = vld [vmem:[#allocation5 + $0xb8] sm:$0xff]  ;;  %v60_v26 = vld [vmem:[#allocation5 + $0x30] sm:$0xff]  ;;  %p305_p5 = por %p304_p4, %p303_p3 }
  0x2c   :  { %216 = vmatprep.subr.bf16.mxu0 %v215_v14  ;;  %v221_v24 = vpack.c.bf16 %v59_v21, %v58_v20  ;;  %v223_v25 = vpack.c.bf16 %v77_v23, %v76_v22  ;;  %v61_v27 = vld [vmem:[#allocation5 + $0x38] sm:$0xff]  ;;  %v78_v29 = vld [vmem:[#allocation5 + $0xc0] sm:$0xff]  ;;  %v79_v30 = vld [vmem:[#allocation5 + $0xc8] sm:$0xff] }
  0x2d   :  { %v225_v28 = vpack.c.bf16 %v61_v27, %v60_v26  ;;  %v227_v31 = vpack.c.bf16 %v79_v30, %v78_v29  ;;  %v62_v32 = vld [vmem:[#allocation5 + $0x40] sm:$0xff]  ;;  %v63_v33 = vld [vmem:[#allocation5 + $0x48] sm:$0xff]  ;;  %v80_v35 = vld [vmem:[#allocation5 + $0xd0] sm:$0xff]  ;;  %p306_p6 = pnand %p305_p5, %p299_p2 }
  0x2e   :  { %v229_v34 = vpack.c.bf16 %v63_v33, %v62_v32  ;;  %v81_v36 = vld [vmem:[#allocation5 + $0xd8] sm:$0xff]  ;;  %v64_v38 = vld [vmem:[#allocation5 + $0x50] sm:$0xff]  ;;  %v82_v41 = vld [vmem:[#allocation5 + $0xe0] sm:$0xff] }
  0x2f   :  { %218 = vmatpush3.bf16.msra.mxu0 %v217_v18  ;;  %v231_v37 = vpack.c.bf16 %v81_v36, %v80_v35  ;;  %v65_v39 = vld [vmem:[#allocation5 + $0x58] sm:$0xff]  ;;  %v83_v42 = vld [vmem:[#allocation5 + $0xe8] sm:$0xff]  ;;  %v66_v43 = vld [vmem:[#allocation5 + $0x60] sm:$0xff] }
  0x30   :  { %220 = vmatprep.subr.bf16.mxu0 %v219_v19  ;;  %v233_v40 = vpack.c.bf16 %v65_v39, %v64_v38  ;;  %v235_v44 = vpack.c.bf16 %v83_v42, %v82_v41  ;;  %v67_v45 = vld [vmem:[#allocation5 + $0x68] sm:$0xff]  ;;  %v84_v46 = vld [vmem:[#allocation5 + $0xf0] sm:$0xff]  ;;  %v85_v47 = vld [vmem:[#allocation5 + $0xf8] sm:$0xff] }
  0x31   :  { %v237_v48 = vpack.c.bf16 %v67_v45, %v66_v43  ;;  %v239_v49 = vpack.c.bf16 %v85_v47, %v84_v46  ;;  %v68_v50 = vld [vmem:[#allocation5 + $0x70] sm:$0xff]  ;;  %v69_v51 = vld [vmem:[#allocation5 + $0x78] sm:$0xff] }
  0x32   :  { %v241_v52 = vpack.c.bf16 %v69_v51, %v68_v50 }
  0x33   :  { %222 = vmatpush3.bf16.msra.mxu0 %v221_v24 }
  0x34   :  { %224 = vmatprep.subr.bf16.mxu0 %v223_v25 }
  0x37   :  { %226 = vmatpush3.bf16.msra.mxu0 %v225_v28 }
  0x38   :  { %228 = vmatprep.subr.bf16.mxu0 %v227_v31 }
  0x3b   :  { %230 = vmatpush3.bf16.msra.mxu0 %v229_v34 }
  0x3c   :  { %232 = vmatprep.subr.bf16.mxu0 %v231_v37 }
  0x3f   :  { %234 = vmatpush3.bf16.msra.mxu0 %v233_v40 }
  0x40   :  { %236 = vmatprep.subr.bf16.mxu0 %v235_v44 }
  0x43   :  { %238 = vmatpush3.bf16.msra.mxu0 %v237_v48 }
  0x44   :  { %240 = vmatprep.subr.bf16.mxu0 %v239_v49 }
  0x47   :  { %242 = vmatpush3.bf16.msra.mxu0 %v241_v52 }
  0xb8   :  { %v44_v53 = vpop.xlane.xlu0 %43 }
  0xb9   :  { %v45_v54 = vsub.f32 %v377_v3, %v44_v53  ;;  %v46_v55 = vsub.f32 %v379_v4, %v44_v53 }
  0xbb   :  { %v47_v56 = vmul.f32 1.442695, %v45_v54  ;;  %v49_v57 = vmul.f32 1.442695, %v46_v55 }
  0xbd   :  { %248 = vpow2.f32 %v47_v56 }
  0xbe   :  { %250 = vpow2.f32 %v49_v57 }
  0xc7   :  { %v249_v58 = vpop.eup %248 }
  0xc8   :  { %v251_v59 = vpop.eup %250 }
  0xc9   :  { %150 = vmatprep.mubr.f32.mxu0 %v251_v59  ;;  %v51_v60 = vadd.f32 %v251_v59, %v249_v58 }
  0xca   :  { %151 = vmatmul.mubr.f32.vlgmr.msra.gmra.mrb[0].mxu0 %v249_v58 }
  0xcb   :  { %52 = vadd.xlane.f32.xlu0 %v51_v60 }
 0x158   :  { %v53_v61 = vpop.xlane.xlu0 %52 }
 0x159   :  { %252 = vrcp.f32 %v53_v61 }
 0x163   :  { %v253_v1 = vpop.eup %252 }
 0x19d   :  { %v208_v62 = vpop.f32.mrb[0].mxu0 }
 0x19e   :  { %v209_v63 = vpop.f32.mrb[1].mxu0 }
 0x19f   :  { %v210_v0 = vadd.f32 %v209_v63, %v208_v62 }
 0x1a1   :  { %v158_v2 = vmul.f32 %v253_v1, %v210_v0 }
 0x1a3   :  { %159 = vst [vmem:[#allocation7] sm:$0xff] %v158_v2 }
 0x1a4   :  { %309 = shalt.err (!%p306_p6)
}
 0x1a5   :  { %s310_s10 = scalar_lea.hbm %s399_s2, 128 }
 0x1a6   :  { %p311_p7 = scmp.ne.s32.totalorder %s399_s2, %s310_s10  ;;  %p314_p8 = scmp.lt.u32.totalorder %s310_s10, %s399_s2 }
 0x1a8   :  { %p316_p9 = pnand %p314_p8, %p311_p7 }
 0x1aa   :  { %319 = shalt.err (!%p316_p9)
}
 0x1ab   :  { %169 = dma.vmem_to_hbm [thread:$0]  %s167_s6, 128, %s399_s2, [#allocation4]  }
 0x1ac   :  { %324 = dma.done.wait [#allocation4], 128  }
 0x1ad   :  { %325 = vsyncadd [#allocation4], 4294967168 }
 0x1ae   :  { %173 = vsyncpa [#allocation3], 1 }
 0x1af   :  { %174 = vsyncpa [#allocation6], 1 }
 0x1b0   :  { %175 = vsyncpa [#allocation4], 1 }

</bundles_post_ra>
